<compile_context>
chip_gen: v5e
topology: v5e:2x2
jax: 0.10.0
libtpu: 0.0.40
codegen_flags: <defaults>
</compile_context>

<pallas_src>
import functools

import jax
import jax.numpy as jnp
from jax.experimental import pallas as pl
from jax.experimental.pallas import tpu as pltpu


def _round_up(x, m):
    return (x + m - 1) // m * m


def _pick_block_rows(rows, cg, hwp, itemsize, budget_bytes, row_cap=512):
    """Largest row-block that (a) evenly divides rows, (b) holds whole groups,
    (c) keeps the BlockSpec legal (multiple of 8 or == rows), (d) fits the
    per-block VMEM budget (2 MiB blocks sit at ~85% of HBM roofline)."""
    valid = [d for d in range(1, rows + 1)
             if rows % d == 0 and d % cg == 0 and (d % 8 == 0 or d == rows)]
    within = [d for d in valid
              if d <= row_cap and d * hwp * itemsize <= budget_bytes]
    if within:
        return max(within)
    # TODO(synk): if even a single group (cg rows x hwp) exceeds the VMEM
    # budget (huge H*W; matters most on v7x's 64 MiB VMEM), tile H*W with a
    # two-phase reduction (stats pass + normalize pass) instead of loading
    # whole groups at once.
    return min(valid)


def _group_norm_kernel(x_ref, pool_ref, wb_ref, o_ref, *, n_elem, eps):
    x = x_ref[...].astype(jnp.float32)                  # (BR, HWp)

    # Fused single sweep: per-row sum and sum-of-squares (lane reductions).
    rs = jnp.sum(x, axis=-1, keepdims=True)             # (BR, 1)
    rq = jnp.sum(x * x, axis=-1, keepdims=True)         # (BR, 1)

    # Block-diagonal pooling matmul: segmented sum over the Cg rows of each
    # group AND broadcast back to every row in one tiny (resident) MXU op.
    pool = pool_ref[...]                                # (BR, BR) f32 of 0/1
    gsum = jnp.dot(pool, rs, preferred_element_type=jnp.float32)   # (BR, 1)
    gsq = jnp.dot(pool, rq, preferred_element_type=jnp.float32)    # (BR, 1)

    mean = gsum * (1.0 / n_elem)
    # torch.Tensor.var() defaults to the *unbiased* estimator (divide by n-1),
    # matching the original module's `x.var(-1, keepdim=True)`.
    denom = max(n_elem - 1, 1)
    var = (gsq - gsum * mean) * (1.0 / denom)
    inv_std = jax.lax.rsqrt(var + eps)                  # (BR, 1)

    # Fold normalize + per-channel affine: out = x * a + c.  All the stat math
    # stays on tiny (BR, 1)/(BR, 2) vectors; the block sees one FMA pass.
    wb = wb_ref[...]                                    # (BR, 2): [weight|bias]
    a = inv_std * wb[:, 0:1]
    c = wb[:, 1:2] - mean * a
    o_ref[...] = (x * a + c).astype(o_ref.dtype)


def group_norm(x, weight, bias, *, num_groups=32, eps=1e-5,
               block_bytes=2 * 1024 * 1024):
    """GroupNorm forward matching the PyTorch module semantics.

    x:      (N, C, H, W)
    weight: (1, C, 1, 1)
    bias:   (1, C, 1, 1)
    """
    N, C, H, W = x.shape
    G = num_groups
    assert C % G == 0
    Cg = C // G
    HW = H * W
    HWp = _round_up(HW, 128)          # lane-dense, unmasked loads/stores
    rows = N * C
    itemsize = jnp.dtype(x.dtype).itemsize

    # Channel-per-row layout; pad the spatial axis in the wrapper so the
    # kernel never emits masked partial stores.  Pad zeros don't perturb the
    # sums; the true element count n_elem is used for the statistics.
    x2 = x.reshape(rows, HW)
    if HWp != HW:
        x2 = jnp.pad(x2, ((0, 0), (0, HWp - HW)))

    BR = _pick_block_rows(rows, Cg, HWp, itemsize, block_bytes)
    grid = (rows // BR,)

    # Per-row (= per (n, c)) affine parameters packed into one side input:
    # row r -> channel r % C; column 0 = weight, column 1 = bias.
    w_rows = jnp.tile(weight.reshape(C).astype(jnp.float32), N)
    b_rows = jnp.tile(bias.reshape(C).astype(jnp.float32), N)
    wb_rows = jnp.stack([w_rows, b_rows], axis=-1)      # (rows, 2)

    # Pooling matrix: local rows i, j are in the same group iff i//Cg == j//Cg
    # (valid for every block because BR % Cg == 0, so blocks start on group
    # boundaries).  Same block index for every grid step -> stays resident.
    gid = jnp.arange(BR) // Cg
    pool = (gid[:, None] == gid[None, :]).astype(jnp.float32)

    n_elem = Cg * HW                  # true (unpadded) group size
    nelems = N * C * HW
    cost = pl.CostEstimate(
        flops=6 * nelems,
        transcendentals=rows,
        bytes_accessed=2 * nelems * itemsize + 2 * rows * 4 + BR * BR * 4,
    )

    out2 = pl.pallas_call(
        functools.partial(_group_norm_kernel, n_elem=n_elem, eps=eps),
        out_shape=jax.ShapeDtypeStruct((rows, HWp), x.dtype),
        grid=grid,
        in_specs=[
            pl.BlockSpec((BR, HWp), lambda i: (i, 0)),
            pl.BlockSpec((BR, BR), lambda i: (0, 0)),
            pl.BlockSpec((BR, 2), lambda i: (i, 0)),
        ],
        out_specs=pl.BlockSpec((BR, HWp), lambda i: (i, 0)),
        compiler_params=pltpu.CompilerParams(
            dimension_semantics=("parallel",),
            vmem_limit_bytes=32 * 1024 * 1024,
        ),
        cost_estimate=cost,
    )(x2, pool, wb_rows)

    if HWp != HW:
        out2 = out2[:, :HW]
    return out2.reshape(N, C, H, W)


def group_norm_reference(x, weight, bias, *, num_groups, eps=1e-5):
    N, C, H, W = x.shape
    G = num_groups
    xr = x.reshape(N, G, -1).astype(jnp.float32)
    mean = xr.mean(-1, keepdims=True)
    var = xr.var(-1, keepdims=True, ddof=1)   # unbiased, like torch .var()
    xn = (xr - mean) / jnp.sqrt(var + eps)
    xn = xn.reshape(N, C, H, W)
    return xn * weight + bias


if __name__ == "__main__":
    # Module config: num_features=8, num_groups=4 (C % G == 0), eps=1e-5.
    N, C, H, W = 2, 8, 16, 16
    G = 4
    eps = 1e-5

    key = jax.random.PRNGKey(0)
    kx, kw, kb = jax.random.split(key, 3)
    x = jax.random.normal(kx, (N, C, H, W), dtype=jnp.float32)
    # Parameters shaped per GroupNorm.__init__ (1, C, 1, 1); random values to
    # exercise the fused affine path.
    weight = 1.0 + 0.1 * jax.random.normal(kw, (1, C, 1, 1), dtype=jnp.float32)
    bias = 0.1 * jax.random.normal(kb, (1, C, 1, 1), dtype=jnp.float32)

    out = group_norm(x, weight, bias, num_groups=G, eps=eps)
    out = jax.block_until_ready(out)

    ref = group_norm_reference(x, weight, bias, num_groups=G, eps=eps)
    assert out.shape == (N, C, H, W)
    assert jnp.allclose(out, ref, atol=1e-4, rtol=1e-4)

    print("KERNEL_OK")
</pallas_src>

<mosaic_0001>
module attributes {stable_mosaic.version = 11 : i64} {
  func.func @_group_norm_kernel(%arg0: i32, %arg1: memref<16x256xf32, #tpu.memory_space<vmem>>, %arg2: memref<16x16xf32, #tpu.memory_space<vmem>>, %arg3: memref<16x2xf32, #tpu.memory_space<vmem>>, %arg4: memref<16x256xf32, #tpu.memory_space<vmem>>) attributes {dimension_semantics = [#tpu.dimension_semantics<parallel>], iteration_bounds = array<i64: 1>, scalar_prefetch = 0 : i64, scratch_operands = 0 : i64, tpu.core_type = #tpu.core_type<tc>, window_params = [{transform_indices = @transform_0, window_bounds = array<i64: 16, 256>}, {pipeline_mode = #tpu.pipeline_mode<synchronous>, transform_indices = @transform_1, window_bounds = array<i64: 16, 16>}, {transform_indices = @transform_2, window_bounds = array<i64: 16, 2>}, {transform_indices = @transform_3, window_bounds = array<i64: 16, 256>}]} {
    %c0 = arith.constant 0 : index
    %c0_0 = arith.constant 0 : index
    %0 = vector.load %arg1[%c0, %c0_0] : memref<16x256xf32, #tpu.memory_space<vmem>>, vector<16x256xf32>
    %cst = arith.constant dense<0.000000e+00> : vector<16xf32>
    %1 = vector.multi_reduction <add>, %0, %cst [1] : vector<16x256xf32> to vector<16xf32>
    %2 = vector.shape_cast %1 : vector<16xf32> to vector<16x1xf32>
    %3 = arith.mulf %0, %0 : vector<16x256xf32>
    %cst_1 = arith.constant dense<0.000000e+00> : vector<16xf32>
    %4 = vector.multi_reduction <add>, %3, %cst_1 [1] : vector<16x256xf32> to vector<16xf32>
    %5 = vector.shape_cast %4 : vector<16xf32> to vector<16x1xf32>
    %c0_2 = arith.constant 0 : index
    %c0_3 = arith.constant 0 : index
    %6 = vector.load %arg2[%c0_2, %c0_3] : memref<16x16xf32, #tpu.memory_space<vmem>>, vector<16x16xf32>
    %cst_4 = arith.constant dense<0.000000e+00> : vector<16x1xf32>
    %7 = tpu.matmul %6, %2, %cst_4 {dimension_numbers = #tpu.dot_dimension_numbers<[1], [0], [0], [1], [0, 0, 1, 1], [], []>} : vector<16x16xf32>, vector<16x1xf32>, vector<16x1xf32> -> vector<16x1xf32>
    %cst_5 = arith.constant dense<0.000000e+00> : vector<16x1xf32>
    %8 = tpu.matmul %6, %5, %cst_5 {dimension_numbers = #tpu.dot_dimension_numbers<[1], [0], [0], [1], [0, 0, 1, 1], [], []>} : vector<16x16xf32>, vector<16x1xf32>, vector<16x1xf32> -> vector<16x1xf32>
    %cst_6 = arith.constant 0.001953125 : f32
    %9 = vector.broadcast %cst_6 : f32 to vector<16x1xf32>
    %10 = arith.mulf %7, %9 : vector<16x1xf32>
    %11 = arith.mulf %7, %10 : vector<16x1xf32>
    %12 = arith.subf %8, %11 : vector<16x1xf32>
    %cst_7 = arith.constant 0.00195694715 : f32
    %13 = vector.broadcast %cst_7 : f32 to vector<16x1xf32>
    %14 = arith.mulf %12, %13 : vector<16x1xf32>
    %cst_8 = arith.constant 9.99999974E-6 : f32
    %15 = vector.broadcast %cst_8 : f32 to vector<16x1xf32>
    %16 = arith.addf %14, %15 : vector<16x1xf32>
    %17 = math.rsqrt %16 : vector<16x1xf32>
    %c0_9 = arith.constant 0 : index
    %c0_10 = arith.constant 0 : index
    %18 = vector.load %arg3[%c0_9, %c0_10] : memref<16x2xf32, #tpu.memory_space<vmem>>, vector<16x2xf32>
    %19 = vector.extract_strided_slice %18 {offsets = [0, 0], sizes = [16, 1], strides = [1, 1]} : vector<16x2xf32> to vector<16x1xf32>
    %20 = arith.mulf %17, %19 : vector<16x1xf32>
    %21 = vector.extract_strided_slice %18 {offsets = [0, 1], sizes = [16, 1], strides = [1, 1]} : vector<16x2xf32> to vector<16x1xf32>
    %22 = arith.mulf %10, %20 : vector<16x1xf32>
    %23 = arith.subf %21, %22 : vector<16x1xf32>
    %24 = vector.broadcast %20 : vector<16x1xf32> to vector<16x256xf32>
    %25 = arith.mulf %0, %24 : vector<16x256xf32>
    %26 = vector.broadcast %23 : vector<16x1xf32> to vector<16x256xf32>
    %27 = arith.addf %25, %26 : vector<16x256xf32>
    %c0_11 = arith.constant 0 : index
    %c0_12 = arith.constant 0 : index
    %28 = vector.load %arg4[%c0_11, %c0_12] : memref<16x256xf32, #tpu.memory_space<vmem>>, vector<16x256xf32>
    tpu.vector_store %arg4[%c0_11, %c0_12], %27 {strides = array<i32>} : memref<16x256xf32, #tpu.memory_space<vmem>>, vector<16x256xf32>,
    return
  }
  func.func @transform_0(%arg0: i32) -> (i32, i32) {
    %c0_i32 = arith.constant 0 : i32
    %c0_i32_0 = arith.constant 0 : i32
    return %arg0, %c0_i32 : i32, i32
  }
  func.func @transform_1(%arg0: i32) -> (i32, i32) {
    %c0_i32 = arith.constant 0 : i32
    %c0_i32_0 = arith.constant 0 : i32
    %c0_i32_1 = arith.constant 0 : i32
    return %c0_i32, %c0_i32_0 : i32, i32
  }
  func.func @transform_2(%arg0: i32) -> (i32, i32) {
    %c0_i32 = arith.constant 0 : i32
    %c0_i32_0 = arith.constant 0 : i32
    return %arg0, %c0_i32 : i32, i32
  }
  func.func @transform_3(%arg0: i32) -> (i32, i32) {
    %c0_i32 = arith.constant 0 : i32
    %c0_i32_0 = arith.constant 0 : i32
    return %arg0, %c0_i32 : i32, i32
  }
}

</mosaic_0001>

<bundles_post_ra>
// kernel: tpu_custom_call.1
= control target key start
LH: loop header
LB: loop body
LE: loop exit
PB: predicated region body
PF: predicated region fallthrough
CT: control target
= control target key end

     0   :  { %8 = vsyncpa [#allocation3], 0  ;;  %s353_s0 = inlined_call_operand.hbm [shape: f32[16,256], index: 0, kind: input, shape index: {}]   ;;  %s354_s1 = inlined_call_operand.vmem [shape: f32[16,16], index: 1, kind: input, shape index: {}]   ;;  %s355_s2 = inlined_call_operand.vmem [shape: f32[16,2], index: 2, kind: input, shape index: {}]   ;;  %s356_s3 = inlined_call_operand.hbm [shape: f32[16,256], index: 3, kind: output, shape index: {}]  }
   0x1   :  { %9 = vsyncpa [#allocation4], 0  ;;  %s14_s14 = sshll.u32 %s353_s0, 4  ;;  %s278_s15 = smov [#allocation2]   ;;  %s15_s14 = int_to_ptr.hbm [resolvable:$true] %s14_s14 }
   0x2   :  { %s16_s16 = sshll.u32 %s278_s15, 4  ;;  %s279_s17 = smov 256   ;;  %s17_s16 = int_to_ptr.vmem [resolvable:$true] %s16_s16 }
   0x3   :  { %s280_s18 = smov 16  }
   0x4   :  { %22 = dma.hbm_to_vmem [thread:$0]  %s15_s14, 512, %s17_s16, [#allocation3], %s279_s17, %s279_s17, %s280_s18  }
   0x5   :  { %274 = dma.done.wait [#allocation3], 512  }
   0x6   :  { %275 = vsyncadd [#allocation3], 4294966784  ;;  %v311_v0 = vld [vmem:[#allocation2 + $0x10] sm:$0xff]  ;;  %v313_v1 = vld [vmem:[#allocation2 + $0x18] sm:$0xff]  ;;  %vm53_vm0 = vcmask 130048   ;;  %v281_v18 = vmov 0  }
   0x7   :  { %v38_v2 = vadd.f32 %v313_v1, %v311_v0  ;;  %v43_v3 = vmul.f32 %v311_v0, %v311_v0  ;;  %v44_v4 = vmul.f32 %v313_v1, %v313_v1  ;;  %v321_v6 = vld [vmem:[#allocation2] sm:$0xff]  ;;  %v323_v7 = vld [vmem:[#allocation2 + $0x8] sm:$0xff]  ;;  %218 = vset.pattern.permute.xlu0 %v281_v18  ;;  %219 = vset.pattern.permute.xlu1 %v281_v18  ;;  %s282_s25 = smov 1   ;;  %v283_v53 = vmov 1   ;;  %s190_s29 = sshll.u32 %s356_s3, 4  ;;  %s191_s29 = int_to_ptr.hbm [resolvable:$true] %s190_s29 }
   0x8   :  { %v41_v8 = vmul.f32 %v321_v6, %v321_v6  ;;  %v42_v9 = vmul.f32 %v323_v7, %v323_v7  ;;  %v35_v10 = vadd.f32 %v323_v7, %v321_v6  ;;  %v51_v14 = vld [vmem:[%s354_s1] sm:$0xff]  ;;  %v52_v15 = vld [vmem:[%s354_s1 + $0x8] sm:$0xff]  ;;  %220 = vset.pattern.permute.xlu2 %v283_v53 }
   0x9   :  { %39 = vadd.xlane.f32.xlu0 %v38_v2  ;;  %v48_v5 = vadd.f32 %v44_v4, %v43_v3  ;;  %v136_v42 = vld [vmem:[%s355_s2] sm:$0xff]  ;;  %v137_v49 = vld [vmem:[%s355_s2 + $0x8] sm:$0xff]  ;;  %s284_s2 = smov [#allocation5]  }
   0xa   :  { %v45_v11 = vadd.f32 %v42_v9, %v41_v8  ;;  %s188_s26 = sshll.u32 %s284_s2, 4  ;;  %s189_s26 = int_to_ptr.vmem [resolvable:$true] %s188_s26 }
   0xb   :  { %49 = vadd.xlane.f32.xlu1 %v48_v5 }
  0x11   :  { %36 = vadd.xlane.f32.xlu0 %v35_v10 }
  0x13   :  { %46 = vadd.xlane.f32.xlu1 %v45_v11 }
  0x7c   :  { %v40_v12 = vpop.xlane.xlu0 %39 }
  0x7d   :  { %74 = vmatpush.msra.mxu0 %v40_v12  ;;  %207 = vmatpush.msra.mxu2 %v40_v12 }
  0x7e   :  { %v50_v13 = vpop.xlane.xlu1 %49 }
  0x7f   :  { %97 = vmatpush.msra.mxu1 %v50_v13  ;;  %209 = vmatpush.msra.mxu3 %v50_v13 }
  0x84   :  { %v37_v16 = vpop.xlane.xlu0 %36 }
  0x85   :  { %75 = vmatpush.msra.mxu0 %v37_v16  ;;  %208 = vmatpush.msra.mxu2 %v37_v16 }
  0x86   :  { %203 = vmatmul.msk.f32.vlgmr.msra.gmra.mxu0 %vm53_vm0, %v51_v14  ;;  %204 = vmatmul.msk.f32.vlgmr.msra.gmra.mxu2 %vm53_vm0, %v52_v15  ;;  %v47_v17 = vpop.xlane.xlu1 %46 }
  0x87   :  { %98 = vmatpush.msra.mxu1 %v47_v17  ;;  %210 = vmatpush.msra.mxu3 %v47_v17 }
  0x88   :  { %205 = vmatmul.msk.f32.vlgmr.msra.gmra.mxu1 %vm53_vm0, %v51_v14  ;;  %206 = vmatmul.msk.f32.vlgmr.msra.gmra.mxu3 %vm53_vm0, %v52_v15 }
 0x103   :  { %v77_v19 = vpop.f32.mrf.mxu0 }
 0x104   :  { %v106_v20 = vmul.f32 0.001953125, %v77_v19 }
 0x105   :  { %v100_v21 = vpop.f32.mrf.mxu1 }
 0x106   :  { %v108_v22 = vmul.f32 %v106_v20, %v77_v19 }
 0x108   :  { %v110_v23 = vsub.f32 %v100_v21, %v108_v22 }
 0x109   :  { %v80_v24 = vpop.f32.mrf.mxu2 }
 0x10a   :  { %v112_v25 = vmul.f32 0.0019569471, %v110_v23  ;;  %v107_v26 = vmul.f32 0.001953125, %v80_v24 }
 0x10b   :  { %v103_v27 = vpop.f32.mrf.mxu3 }
 0x10c   :  { %v114_v28 = vadd.f32 1e-05, %v112_v25  ;;  %v109_v29 = vmul.f32 %v107_v26, %v80_v24 }
 0x10e   :  { %222 = vrsqrt.f32 %v114_v28  ;;  %v111_v30 = vsub.f32 %v103_v27, %v109_v29  ;;  %vm122_vm2 = vweird.f32 %v114_v28 }
 0x110   :  { %v113_v31 = vmul.f32 0.0019569471, %v111_v30 }
 0x112   :  { %v115_v32 = vadd.f32 1e-05, %v113_v31 }
 0x114   :  { %v223_v33 = vpop.eup %222  ;;  %224 = vrsqrt.f32 %v115_v32  ;;  %vm132_vm5 = vweird.f32 %v115_v32 }
 0x115   :  { %v117_v34 = vmul.f32 %v223_v33, %v114_v28  ;;  %vm123_vm1 = vweird.f32 %v223_v33 }
 0x116   :  { %vm124_vm3 = vmor %vm122_vm2, %vm123_vm1 }
 0x117   :  { %v118_v35 = vmul.f32 %v223_v33, %v117_v34 }
 0x119   :  { %v119_v36 = vmul.f32 0.5, %v118_v35 }
 0x11a   :  { %v225_v37 = vpop.eup %224 }
 0x11b   :  { %v120_v38 = vsub.f32 1.5, %v119_v36  ;;  %v127_v39 = vmul.f32 %v225_v37, %v115_v32  ;;  %vm133_vm4 = vweird.f32 %v225_v37 }
 0x11c   :  { %vm134_vm6 = vmor %vm132_vm5, %vm133_vm4 }
 0x11d   :  { %v128_v40 = vmul.f32 %v225_v37, %v127_v39  ;;  %v121_v41 = vmul.f32 %v223_v33, %v120_v38 }
 0x11f   :  { %v129_v43 = vmul.f32 0.5, %v128_v40  ;;  %v125_v44 = vsel %vm124_vm3, %v223_v33, %v121_v41 }
 0x120   :  { %v138_v45 = vmul.f32 %v136_v42, %v125_v44 }
 0x121   :  { %v130_v46 = vsub.f32 1.5, %v129_v43 }
 0x122   :  { %154 = vperm.xlu0 %218, %v138_v45   ;;  %v140_v47 = vmul.f32 %v138_v45, %v106_v20 }
 0x123   :  { %v131_v48 = vmul.f32 %v225_v37, %v130_v46 }
 0x124   :  { %144 = vrot.lane.b32.xlu2 %v140_v47, %s282_s25 }
 0x125   :  { %v135_v50 = vsel %vm134_vm6, %v225_v37, %v131_v48 }
 0x126   :  { %v139_v51 = vmul.f32 %v137_v49, %v135_v50 }
 0x128   :  { %159 = vperm.xlu1 %219, %v139_v51   ;;  %v141_v52 = vmul.f32 %v139_v51, %v107_v26 }
 0x12a   :  { %221 = vset.pattern.permute.xlu0 %v283_v53 }
 0x12c   :  { %146 = vrot.lane.b32.xlu2 %v141_v52, %s282_s25 }
 0x17e   :  { %v145_v54 = vpop.permute.xlu2 %144 }
 0x17f   :  { %v150_v55 = vsub.f32 %v136_v42, %v145_v54 }
 0x181   :  { %168 = vperm.xlu2 %220, %v150_v55  }
 0x186   :  { %v147_v56 = vpop.permute.xlu2 %146 }
 0x187   :  { %v151_v57 = vsub.f32 %v137_v49, %v147_v56 }
 0x189   :  { %173 = vperm.xlu2 %220, %v151_v57  }
 0x194   :  { %v155_v58 = vpop.permute.xlu0 %154 }
 0x195   :  { %v162_v59 = vmul.f32 %v155_v58, %v321_v6  ;;  %v163_v60 = vmul.f32 %v155_v58, %v323_v7 }
 0x19a   :  { %v160_v2 = vpop.permute.xlu1 %159 }
 0x19b   :  { %v164_v3 = vmul.f32 %v160_v2, %v311_v0  ;;  %v165_v4 = vmul.f32 %v160_v2, %v313_v1 }
 0x1db   :  { %v169_v61 = vpop.permute.xlu2 %168 }
 0x1dc   :  { %v176_v62 = vadd.f32 %v169_v61, %v162_v59  ;;  %v177_v63 = vadd.f32 %v169_v61, %v163_v60 }
 0x1de   :  { %180 = vst [vmem:[#allocation5] sm:$0xff] %v176_v62 }
 0x1df   :  { %181 = vst [vmem:[#allocation5 + $0x8] sm:$0xff] %v177_v63 }
 0x1e3   :  { %v174_v5 = vpop.permute.xlu2 %173 }
 0x1e4   :  { %v178_v6 = vadd.f32 %v174_v5, %v164_v3  ;;  %v179_v8 = vadd.f32 %v174_v5, %v165_v4 }
 0x1e6   :  { %182 = vst [vmem:[#allocation5 + $0x10] sm:$0xff] %v178_v6 }
 0x1e7   :  { %183 = vst [vmem:[#allocation5 + $0x18] sm:$0xff] %v179_v8 }
 0x1e8   :  { %196 = dma.vmem_to_hbm [thread:$0]  %s189_s26, 512, %s191_s29, [#allocation4], %s279_s17, %s279_s17, %s280_s18  }
 0x1e9   :  { %276 = dma.done.wait [#allocation4], 512  }
 0x1ea   :  { %277 = vsyncadd [#allocation4], 4294966784 }
 0x1eb   :  { %201 = vsyncpa [#allocation3], 1 }
 0x1ec   :  { %202 = vsyncpa [#allocation4], 1 }

</bundles_post_ra>
